<compile_context>
chip_gen: v6e
topology: v6e:2x2x1
jax: 0.10.0
libtpu: 0.0.40
codegen_flags: <defaults>
</compile_context>

<pallas_src>
import functools

import jax
import jax.numpy as jnp
from jax.experimental import pallas as pl
from jax.experimental.pallas import tpu as pltpu


def _mish(y):
    """mish(y) = y * tanh(softplus(y)), one exp per element, overflow-safe f32."""
    u = jnp.exp(-jnp.abs(y))          # u in (0, 1]
    u2 = u * u
    two_u = 2.0 * u
    pos = y >= 0.0
    num = jnp.where(pos, 1.0 + two_u, two_u + u2)
    den = jnp.where(pos, 1.0 + two_u + 2.0 * u2, 2.0 + two_u + u2)
    return y * (num / den)


def _linear_mish_mish_kernel(x_ref, w_ref, b_ref, o_ref, *, use_bf16_matmul):
    x = x_ref[...]                         # (bt, Fin)
    w = w_ref[...]                         # (Fin, Fout_p)  -- pre-transposed, lane-dense
    if use_bf16_matmul:
        x = x.astype(jnp.bfloat16)
        w = w.astype(jnp.bfloat16)
    # Canonical (M,K)x(K,N) MXU contraction, f32 accumulation.
    y = jnp.dot(x, w, preferred_element_type=jnp.float32)
    y = y + b_ref[...].astype(jnp.float32)
    y = _mish(y)
    y = _mish(y)
    o_ref[...] = y.astype(o_ref.dtype)


def linear_mish_mish(x, weight, bias, *, block_b=512, use_bf16_matmul=True):
    """x:(B,Fin)  weight:(Fout,Fin)  bias:(Fout,)  ->  (B,Fout)."""
    B, Fin = x.shape
    Fout, _ = weight.shape

    # Lane-dense output: pad Fout to a multiple of 128 (zero columns).
    Fout_p = ((Fout + 127) // 128) * 128
    w_t = jnp.pad(weight.T, ((0, 0), (0, Fout_p - Fout)))          # (Fin, Fout_p)
    b_p = jnp.pad(bias, (0, Fout_p - Fout)).reshape(1, Fout_p)     # (1, Fout_p)

    # Sublane-aligned batch tile (multiple of 8), pad B up to a multiple of it.
    bt = min(block_b, ((B + 7) // 8) * 8)
    B_p = ((B + bt - 1) // bt) * bt
    x_p = jnp.pad(x, ((0, B_p - B), (0, 0))) if B_p != B else x

    grid = (B_p // bt,)
    kernel = functools.partial(_linear_mish_mish_kernel,
                               use_bf16_matmul=use_bf16_matmul)

    out = pl.pallas_call(
        kernel,
        out_shape=jax.ShapeDtypeStruct((B_p, Fout_p), x.dtype),
        grid=grid,
        in_specs=[
            pl.BlockSpec((bt, Fin), lambda i: (i, 0)),       # x tile
            pl.BlockSpec((Fin, Fout_p), lambda i: (0, 0)),   # full weight
            pl.BlockSpec((1, Fout_p), lambda i: (0, 0)),     # full bias
        ],
        out_specs=pl.BlockSpec((bt, Fout_p), lambda i: (i, 0)),
        compiler_params=pltpu.CompilerParams(
            dimension_semantics=("parallel",),
            # Explicit, generation-safe budget (fits v7x's 64 MiB with headroom;
            # footprint here is a few hundred KiB even at bt=512).
            vmem_limit_bytes=32 << 20,
        ),
    )(x_p, w_t, b_p)

    return out[:B, :Fout]


def reference(x, weight, bias):
    y = x @ weight.T + bias
    sp = jnp.logaddexp(y, 0.0)
    y = y * jnp.tanh(sp)
    sp = jnp.logaddexp(y, 0.0)
    y = y * jnp.tanh(sp)
    return y


if __name__ == "__main__":
    in_features = 10
    out_features = 20
    batch = 8

    key = jax.random.PRNGKey(0)
    kx, kw, kb = jax.random.split(key, 3)

    x = jax.random.normal(kx, (batch, in_features), dtype=jnp.float32)
    # Deterministic init mimicking nn.Linear's uniform(-1/sqrt(fan_in), 1/sqrt(fan_in))
    bound = 1.0 / (in_features ** 0.5)
    weight = jax.random.uniform(
        kw, (out_features, in_features), minval=-bound, maxval=bound, dtype=jnp.float32
    )
    bias = jax.random.uniform(
        kb, (out_features,), minval=-bound, maxval=bound, dtype=jnp.float32
    )

    ref = reference(x, weight, bias)

    # Exact-f32 MXU path: tight tolerance.
    out_f32 = jax.block_until_ready(
        linear_mish_mish(x, weight, bias, use_bf16_matmul=False))
    assert out_f32.shape == (batch, out_features)
    assert jnp.allclose(out_f32, ref, atol=1e-5, rtol=1e-5), "f32 path mismatch"

    # Default bf16-fed MXU path (f32 accumulate): bf16-operand tolerance.
    out = jax.block_until_ready(linear_mish_mish(x, weight, bias))
    assert out.shape == (batch, out_features)
    assert jnp.allclose(out, ref, atol=2e-2, rtol=2e-2), "bf16 path mismatch"

    print("KERNEL_OK")
</pallas_src>

<mosaic_0001>
module attributes {stable_mosaic.version = 11 : i64} {
  func.func @_linear_mish_mish_kernel(%arg0: i32, %arg1: memref<8x10xf32, #tpu.memory_space<vmem>>, %arg2: memref<10x128xf32, #tpu.memory_space<vmem>>, %arg3: memref<1x128xf32, #tpu.memory_space<vmem>>, %arg4: memref<8x128xf32, #tpu.memory_space<vmem>>) attributes {dimension_semantics = [#tpu.dimension_semantics<parallel>], iteration_bounds = array<i64: 1>, scalar_prefetch = 0 : i64, scratch_operands = 0 : i64, tpu.core_type = #tpu.core_type<tc>, window_params = [{transform_indices = @transform_0, window_bounds = array<i64: 8, 10>}, {pipeline_mode = #tpu.pipeline_mode<synchronous>, transform_indices = @transform_1, window_bounds = array<i64: 10, 128>}, {pipeline_mode = #tpu.pipeline_mode<synchronous>, transform_indices = @transform_2, window_bounds = array<i64: 1, 128>}, {transform_indices = @transform_3, window_bounds = array<i64: 8, 128>}]} {
    %c0 = arith.constant 0 : index
    %c0_0 = arith.constant 0 : index
    %0 = vector.load %arg1[%c0, %c0_0] : memref<8x10xf32, #tpu.memory_space<vmem>>, vector<8x10xf32>
    %c0_1 = arith.constant 0 : index
    %c0_2 = arith.constant 0 : index
    %1 = vector.load %arg2[%c0_1, %c0_2] : memref<10x128xf32, #tpu.memory_space<vmem>>, vector<10x128xf32>
    %cst = arith.constant dense<0.000000e+00> : vector<8x128xf32>
    %2 = tpu.matmul %0, %1, %cst {dimension_numbers = #tpu.dot_dimension_numbers<[1], [0], [0], [1], [0, 0, 1, 1], [], []>} : vector<8x10xf32>, vector<10x128xf32>, vector<8x128xf32> -> vector<8x128xf32>
    %c0_3 = arith.constant 0 : index
    %c0_4 = arith.constant 0 : index
    %3 = vector.load %arg3[%c0_3, %c0_4] : memref<1x128xf32, #tpu.memory_space<vmem>>, vector<1x128xf32>
    %4 = vector.broadcast %3 : vector<1x128xf32> to vector<8x128xf32>
    %5 = arith.addf %2, %4 : vector<8x128xf32>
    %6 = math.absf %5 : vector<8x128xf32>
    %cst_5 = arith.constant 0.000000e+00 : f32
    %7 = vector.broadcast %cst_5 : f32 to vector<8x128xf32>
    %8 = arith.subf %7, %6 : vector<8x128xf32>
    %9 = math.exp %8 : vector<8x128xf32>
    %10 = arith.mulf %9, %9 : vector<8x128xf32>
    %cst_6 = arith.constant 2.000000e+00 : f32
    %11 = vector.broadcast %cst_6 : f32 to vector<8x128xf32>
    %12 = arith.mulf %11, %9 : vector<8x128xf32>
    %cst_7 = arith.constant 0.000000e+00 : f32
    %13 = vector.broadcast %cst_7 : f32 to vector<8x128xf32>
    %14 = arith.cmpf oge, %5, %13 : vector<8x128xf32>
    %cst_8 = arith.constant 1.000000e+00 : f32
    %15 = vector.broadcast %cst_8 : f32 to vector<8x128xf32>
    %16 = arith.addf %15, %12 : vector<8x128xf32>
    %17 = arith.addf %12, %10 : vector<8x128xf32>
    %18 = arith.select %14, %16, %17 : vector<8x128xi1>, vector<8x128xf32>
    %cst_9 = arith.constant 1.000000e+00 : f32
    %19 = vector.broadcast %cst_9 : f32 to vector<8x128xf32>
    %20 = arith.addf %19, %12 : vector<8x128xf32>
    %cst_10 = arith.constant 2.000000e+00 : f32
    %21 = vector.broadcast %cst_10 : f32 to vector<8x128xf32>
    %22 = arith.mulf %21, %10 : vector<8x128xf32>
    %23 = arith.addf %20, %22 : vector<8x128xf32>
    %cst_11 = arith.constant 2.000000e+00 : f32
    %24 = vector.broadcast %cst_11 : f32 to vector<8x128xf32>
    %25 = arith.addf %24, %12 : vector<8x128xf32>
    %26 = arith.addf %25, %10 : vector<8x128xf32>
    %27 = arith.select %14, %23, %26 : vector<8x128xi1>, vector<8x128xf32>
    %28 = arith.divf %18, %27 : vector<8x128xf32>
    %29 = arith.mulf %5, %28 : vector<8x128xf32>
    %30 = math.absf %29 : vector<8x128xf32>
    %cst_12 = arith.constant 0.000000e+00 : f32
    %31 = vector.broadcast %cst_12 : f32 to vector<8x128xf32>
    %32 = arith.subf %31, %30 : vector<8x128xf32>
    %33 = math.exp %32 : vector<8x128xf32>
    %34 = arith.mulf %33, %33 : vector<8x128xf32>
    %cst_13 = arith.constant 2.000000e+00 : f32
    %35 = vector.broadcast %cst_13 : f32 to vector<8x128xf32>
    %36 = arith.mulf %35, %33 : vector<8x128xf32>
    %cst_14 = arith.constant 0.000000e+00 : f32
    %37 = vector.broadcast %cst_14 : f32 to vector<8x128xf32>
    %38 = arith.cmpf oge, %29, %37 : vector<8x128xf32>
    %cst_15 = arith.constant 1.000000e+00 : f32
    %39 = vector.broadcast %cst_15 : f32 to vector<8x128xf32>
    %40 = arith.addf %39, %36 : vector<8x128xf32>
    %41 = arith.addf %36, %34 : vector<8x128xf32>
    %42 = arith.select %38, %40, %41 : vector<8x128xi1>, vector<8x128xf32>
    %cst_16 = arith.constant 1.000000e+00 : f32
    %43 = vector.broadcast %cst_16 : f32 to vector<8x128xf32>
    %44 = arith.addf %43, %36 : vector<8x128xf32>
    %cst_17 = arith.constant 2.000000e+00 : f32
    %45 = vector.broadcast %cst_17 : f32 to vector<8x128xf32>
    %46 = arith.mulf %45, %34 : vector<8x128xf32>
    %47 = arith.addf %44, %46 : vector<8x128xf32>
    %cst_18 = arith.constant 2.000000e+00 : f32
    %48 = vector.broadcast %cst_18 : f32 to vector<8x128xf32>
    %49 = arith.addf %48, %36 : vector<8x128xf32>
    %50 = arith.addf %49, %34 : vector<8x128xf32>
    %51 = arith.select %38, %47, %50 : vector<8x128xi1>, vector<8x128xf32>
    %52 = arith.divf %42, %51 : vector<8x128xf32>
    %53 = arith.mulf %29, %52 : vector<8x128xf32>
    %c0_19 = arith.constant 0 : index
    %c0_20 = arith.constant 0 : index
    %54 = vector.load %arg4[%c0_19, %c0_20] : memref<8x128xf32, #tpu.memory_space<vmem>>, vector<8x128xf32>
    tpu.vector_store %arg4[%c0_19, %c0_20], %53 {strides = array<i32>} : memref<8x128xf32, #tpu.memory_space<vmem>>, vector<8x128xf32>,
    return
  }
  func.func @transform_0(%arg0: i32) -> (i32, i32) {
    %c0_i32 = arith.constant 0 : i32
    %c0_i32_0 = arith.constant 0 : i32
    return %arg0, %c0_i32 : i32, i32
  }
  func.func @transform_1(%arg0: i32) -> (i32, i32) {
    %c0_i32 = arith.constant 0 : i32
    %c0_i32_0 = arith.constant 0 : i32
    %c0_i32_1 = arith.constant 0 : i32
    return %c0_i32, %c0_i32_0 : i32, i32
  }
  func.func @transform_2(%arg0: i32) -> (i32, i32) {
    %c0_i32 = arith.constant 0 : i32
    %c0_i32_0 = arith.constant 0 : i32
    %c0_i32_1 = arith.constant 0 : i32
    return %c0_i32, %c0_i32_0 : i32, i32
  }
  func.func @transform_3(%arg0: i32) -> (i32, i32) {
    %c0_i32 = arith.constant 0 : i32
    %c0_i32_0 = arith.constant 0 : i32
    return %arg0, %c0_i32 : i32, i32
  }
}

</mosaic_0001>

<bundles_post_ra>
// kernel: tpu_custom_call.1
= control target key start
LH: loop header
LB: loop body
LE: loop exit
PB: predicated region body
PF: predicated region fallthrough
CT: control target
= control target key end

     0   :  { %8 = vsyncpa [#allocation3], 0  ;;  %s315_s0 = inlined_call_operand.hbm [shape: f32[8,10], index: 0, kind: input, shape index: {}]   ;;  %s316_s1 = inlined_call_operand.hbm [shape: f32[10,128], index: 1, kind: input, shape index: {}]   ;;  %s317_s2 = inlined_call_operand.vmem [shape: f32[1,128], index: 2, kind: input, shape index: {}]   ;;  %s318_s3 = inlined_call_operand.hbm [shape: f32[8,128], index: 3, kind: output, shape index: {}]  }
   0x1   :  { %9 = vsyncpa [#allocation6], 0 }
   0x2   :  { %10 = vsyncpa [#allocation4], 0  ;;  %s276_s12 = smov [#allocation2]   ;;  %s277_s14 = smov [#allocation5]  }
   0x3   :  { %s17_s13 = sshll.u32 %s276_s12, 4  ;;  %s26_s15 = sshll.u32 %s277_s14, 4  ;;  %s18_s13 = int_to_ptr.vmem [resolvable:$true] %s17_s13  ;;  %s27_s15 = int_to_ptr.vmem [resolvable:$true] %s26_s15 }
   0x4   :  { %s218_s16 = scalar_lea.vmem %s18_s13, 128  ;;  %p223_p1 = scmp.lt.s32.totalorder %s18_s13, %s18_s13 }
   0x5   :  { %p219_p0 = scmp.ne.s32.totalorder %s18_s13, %s218_s16  ;;  %p224_p2 = scmp.lt.s32.totalorder %s218_s16, %s218_s16 }
   0x7   :  { %p225_p3 = por %p224_p2, %p223_p1 }
   0x9   :  { %p226_p4 = pnand %p225_p3, %p219_p0 }
   0xb   :  { %229 = shalt.err (!%p226_p4)
}
   0xc   :  { %20 = dma.hbm_to_vmem [thread:$0]  %s315_s0, 128, %s18_s13, [#allocation3]  }
   0xd   :  { %s238_s19 = scalar_lea.vmem %s27_s15, 256  ;;  %p243_p6 = scmp.lt.s32.totalorder %s27_s15, %s27_s15 }
   0xe   :  { %p239_p5 = scmp.ne.s32.totalorder %s27_s15, %s238_s19  ;;  %p244_p7 = scmp.lt.s32.totalorder %s238_s19, %s238_s19 }
  0x10   :  { %p245_p8 = por %p244_p7, %p243_p6 }
  0x12   :  { %p246_p9 = pnand %p245_p8, %p239_p5 }
  0x14   :  { %249 = shalt.err (!%p246_p9)
}
  0x15   :  { %s278_s20 = smov 128   ;;  %s279_s21 = smov 8  }
  0x16   :  { %32 = dma.hbm_to_vmem [thread:$0]  %s316_s1, 256, %s27_s15, [#allocation6], %s278_s20, %s278_s20, %s279_s21  }
  0x17   :  { %270 = dma.done.wait [#allocation3], 128  }
  0x18   :  { %271 = vsyncadd [#allocation3], 4294967168 }
  0x19   :  { %272 = dma.done.wait [#allocation6], 256  }
  0x1a   :  { %273 = vsyncadd [#allocation6], 4294967040  ;;  %v280_v0 = vmov 0.0   ;;  %vm281_vm0 = vmmov 0   ;;  %vm55_vm1 = vcmask 1041408   ;;  %v42_v2 = vld [vmem:[#allocation5] sm:$0xff] }
  0x1b   :  { %188 = vmatprep.subr.mxu0 %v280_v0  ;;  %192 = vmatprep.mubr.msk.f32.mxu0 %vm281_vm0, %v280_v0  ;;  %v43_v1 = vld [vmem:[#allocation5 + $0x8] sm:$0x3]  ;;  %v41_v3 = vld [vmem:[#allocation2] sm:$0xff]  ;;  %vm51_vm2 = vcmask 80896   ;;  %s282_s1 = smov [#allocation7]  }
  0x1c   :  { %189 = vmatpush3.msk.msra.mxu0 %vm55_vm1, %v43_v1  ;;  %v182_v4 = vld [vmem:[%s317_s2] ss:$0 sm:$0xff]  ;;  %s172_s2 = sshll.u32 %s282_s1, 4  ;;  %s173_s2 = int_to_ptr.vmem [resolvable:$true] %s172_s2 }
  0x1d   :  { %190 = vmatprep.subr.mxu0 %v280_v0  ;;  %s250_s25 = scalar_lea.vmem %s173_s2, 128  ;;  %p255_p11 = scmp.lt.s32.totalorder %s173_s2, %s173_s2 }
  0x1e   :  { %191 = vmatpush3.msra.mxu0 %v42_v2  ;;  %p251_p10 = scmp.ne.s32.totalorder %s173_s2, %s250_s25  ;;  %p256_p12 = scmp.lt.s32.totalorder %s250_s25, %s250_s25 }
  0x1f   :  { %193 = vmatmul.mubr.msk.f32.vlgmr.msra.gmra.mxu0 %vm51_vm2, %v41_v3 }
  0x20   :  { %p257_p13 = por %p256_p12, %p255_p11 }
  0x22   :  { %p258_p0 = pnand %p257_p13, %p251_p10 }
  0xdf   :  { %v125_v5 = vpop.f32.mrf.mxu0 }
  0xe0   :  { %v126_v6 = vadd.f32 %v182_v4, %v125_v5 }
  0xe1   :  { %v194_v7 = vpop.f32.mrf.mxu0 }
  0xe2   :  { %v129_v8 = vand.u32 2147483647, %v126_v6  ;;  %vm135_vm3 = vcmp.ge.f32.partialorder %v126_v6, 0.0 }
  0xe4   :  { %v130_v9 = vsub.f32 0.0, %v129_v8 }
  0xe6   :  { %v131_v10 = vmul.f32 1.442695, %v130_v9 }
  0xe8   :  { %202 = vpow2.f32 %v131_v10 }
  0xf5   :  { %v203_v11 = vpop.eup %202 }
  0xf6   :  { %v133_v12 = vmul.f32 %v203_v11, %v203_v11  ;;  %v134_v13 = vmul.f32 2.0, %v203_v11 }
  0xf8   :  { %v136_v14 = vadd.f32 1.0, %v134_v13  ;;  %v139_v15 = vmul.f32 2.0, %v133_v12  ;;  %v141_v16 = vadd.f32 2.0, %v134_v13  ;;  %v137_v20 = vadd.f32 %v134_v13, %v133_v12 }
  0xfa   :  { %v140_v17 = vadd.f32 %v139_v15, %v136_v14  ;;  %v142_v18 = vadd.f32 %v141_v16, %v133_v12  ;;  %v138_v22 = vsel %vm135_vm3, %v136_v14, %v137_v20 }
  0xfc   :  { %v143_v19 = vsel %vm135_vm3, %v140_v17, %v142_v18 }
  0xfd   :  { %204 = vrcp.f32 %v143_v19 }
 0x10a   :  { %v205_v21 = vpop.eup %204 }
 0x10b   :  { %v145_v23 = vmul.f32 %v205_v21, %v138_v22 }
 0x10d   :  { %v146_v24 = vmul.f32 %v145_v23, %v126_v6 }
 0x10f   :  { %v147_v25 = vand.u32 2147483647, %v146_v24  ;;  %vm153_vm4 = vcmp.ge.f32.partialorder %v146_v24, 0.0 }
 0x111   :  { %v148_v26 = vsub.f32 0.0, %v147_v25 }
 0x113   :  { %v149_v27 = vmul.f32 1.442695, %v148_v26 }
 0x115   :  { %206 = vpow2.f32 %v149_v27 }
 0x122   :  { %v207_v28 = vpop.eup %206 }
 0x123   :  { %v151_v29 = vmul.f32 %v207_v28, %v207_v28  ;;  %v152_v30 = vmul.f32 2.0, %v207_v28 }
 0x125   :  { %v154_v31 = vadd.f32 1.0, %v152_v30  ;;  %v157_v32 = vmul.f32 2.0, %v151_v29  ;;  %v159_v33 = vadd.f32 2.0, %v152_v30  ;;  %v155_v37 = vadd.f32 %v152_v30, %v151_v29 }
 0x127   :  { %v158_v34 = vadd.f32 %v157_v32, %v154_v31  ;;  %v160_v35 = vadd.f32 %v159_v33, %v151_v29  ;;  %v156_v39 = vsel %vm153_vm4, %v154_v31, %v155_v37 }
 0x129   :  { %v161_v36 = vsel %vm153_vm4, %v158_v34, %v160_v35 }
 0x12a   :  { %208 = vrcp.f32 %v161_v36 }
 0x137   :  { %v209_v38 = vpop.eup %208 }
 0x138   :  { %v163_v40 = vmul.f32 %v209_v38, %v156_v39 }
 0x13a   :  { %v164_v41 = vmul.f32 %v163_v40, %v146_v24 }
 0x13c   :  { %165 = vst [vmem:[#allocation7] sm:$0xff] %v164_v41 }
 0x13d   :  { %261 = shalt.err (!%p258_p0)
}
 0x13e   :  { %175 = dma.vmem_to_hbm [thread:$0]  %s173_s2, 128, %s318_s3, [#allocation4]  }
 0x13f   :  { %274 = dma.done.wait [#allocation4], 128  }
 0x140   :  { %275 = vsyncadd [#allocation4], 4294967168 }
 0x141   :  { %179 = vsyncpa [#allocation3], 1 }
 0x142   :  { %180 = vsyncpa [#allocation6], 1 }
 0x143   :  { %181 = vsyncpa [#allocation4], 1 }

</bundles_post_ra>
